<compile_context>
chip_gen: v7x
topology: tpu7x:2x2x1
jax: 0.10.0
libtpu: 0.0.40
codegen_flags: <defaults>
</compile_context>

<pallas_src>
import functools

import jax
import jax.numpy as jnp
from jax.experimental import pallas as pl
from jax.experimental.pallas import tpu as pltpu

HIDDEN = 256
LANE = 128


def _round_up(x, m):
    return ((x + m - 1) // m) * m


def _actor_kernel(x_ref, w1_ref, b1_ref, w2_ref, b2_ref, w3_ref, b3_ref, o_ref,
                  *, max_action):
    # Layer 1: (TB, S) @ (S, 256) on the MXU, f32 accumulation; bias/relu on VPU (f32).
    x = x_ref[...].astype(w1_ref.dtype)
    h1 = jnp.dot(x, w1_ref[...], preferred_element_type=jnp.float32)
    h1 = jnp.maximum(h1 + b1_ref[...], 0.0)

    # Layer 2: (TB, 256) @ (256, 256) -- the FLOP-dominant, MXU-aligned matmul.
    h2 = jnp.dot(h1.astype(w2_ref.dtype), w2_ref[...],
                 preferred_element_type=jnp.float32)
    h2 = jnp.maximum(h2 + b2_ref[...], 0.0)

    # Layer 3: (TB, 256) @ (256, A_pad); tanh goes to the EUP slot, scale on VPU.
    # Store is a full 128-lane bf16 slab (lane-dense, halves the padded writeback).
    h3 = jnp.dot(h2.astype(w3_ref.dtype), w3_ref[...],
                 preferred_element_type=jnp.float32)
    o_ref[...] = (max_action * jnp.tanh(h3 + b3_ref[...])).astype(o_ref.dtype)


def prepare_actor_params(params):
    """One-time prep hoisted out of the forward hot path: lane-pad the output
    layer so kernel stores are full 128-lane slabs. Padded columns are zero ->
    tanh(0) = 0 and are sliced away by actor_forward."""
    w1, b1, w2, b2, w3, b3 = params
    H, A = w3.shape
    A_pad = _round_up(A, LANE)
    if A_pad != A:
        w3 = jnp.zeros((H, A_pad), w3.dtype).at[:, :A].set(w3)
        b3 = jnp.zeros((1, A_pad), b3.dtype).at[:, :A].set(b3)
    return (w1, b1, w2, b2, w3, b3), A


def actor_forward(state, padded_params, max_action, action_dim, *,
                  block_batch=1024):
    """Fused TD3 Actor MLP.

    state: (B, state_dim) float32; padded_params from prepare_actor_params.
    Returns (B, action_dim) float32.
    """
    w1, b1, w2, b2, w3, b3 = padded_params
    B, S = state.shape
    H = w1.shape[1]
    A_pad = w3.shape[1]

    # Batch tile: multiple of 8 sublanes, capped at block_batch and at
    # ceil(B/2) (rounded to 8) so the grid has >= 2 steps whenever B > 8 ->
    # the "parallel" batch axis can use both v7x TensorCores. Ragged last
    # block is fine: rows are independent and OOB output rows are dropped.
    TB = max(8, min(_round_up(block_batch, 8), _round_up(pl.cdiv(B, 2), 8)))
    grid = (pl.cdiv(B, TB),)

    flops = 2 * B * (S * H + H * H + H * A_pad)
    bytes_accessed = int(
        state.size * state.dtype.itemsize
        + sum(int(a.size) * a.dtype.itemsize for a in (w1, b1, w2, b2, w3, b3))
        + B * A_pad * 2)
    cost = pl.CostEstimate(flops=flops, transcendentals=B * A_pad,
                           bytes_accessed=bytes_accessed)

    # TODO(synk): for tiny rollout batches (B~8-64) the remaining cost is the
    # one-time ~200 KB weight DMA + launch; hiding it needs a cross-call weight
    # prefetch (P10) at the call site, not implemented here.
    kernel = functools.partial(_actor_kernel, max_action=float(max_action))
    out = pl.pallas_call(
        kernel,
        out_shape=jax.ShapeDtypeStruct((B, A_pad), jnp.bfloat16),
        grid=grid,
        in_specs=[
            pl.BlockSpec((TB, S), lambda i: (i, 0)),      # state tile (pipelined)
            pl.BlockSpec((S, H), lambda i: (0, 0)),       # w1 (VMEM-resident)
            pl.BlockSpec((1, H), lambda i: (0, 0)),       # b1
            pl.BlockSpec((H, H), lambda i: (0, 0)),       # w2
            pl.BlockSpec((1, H), lambda i: (0, 0)),       # b2
            pl.BlockSpec((H, A_pad), lambda i: (0, 0)),   # w3 (lane-padded)
            pl.BlockSpec((1, A_pad), lambda i: (0, 0)),   # b3
        ],
        out_specs=pl.BlockSpec((TB, A_pad), lambda i: (i, 0)),
        compiler_params=pltpu.CompilerParams(
            dimension_semantics=("parallel",)),           # v7x dual-TC sharding
        cost_estimate=cost,
    )(state, w1, b1, w2, b2, w3, b3)

    return out[:, :action_dim].astype(jnp.float32)


def init_actor_params(key, state_dim, action_dim, hidden=HIDDEN,
                      weight_dtype=jnp.bfloat16):
    """Init mimicking PyTorch nn.Linear default U[-1/sqrt(fan_in), 1/sqrt(fan_in)].
    Weights stored as (in_features, out_features) in bf16; biases stay f32."""
    keys = jax.random.split(key, 6)

    def linear(kw, kb, fan_in, fan_out):
        bound = 1.0 / float(fan_in) ** 0.5
        w = jax.random.uniform(kw, (fan_in, fan_out), jnp.float32, -bound, bound)
        b = jax.random.uniform(kb, (1, fan_out), jnp.float32, -bound, bound)
        return w.astype(weight_dtype), b

    w1, b1 = linear(keys[0], keys[1], state_dim, hidden)
    w2, b2 = linear(keys[2], keys[3], hidden, hidden)
    w3, b3 = linear(keys[4], keys[5], hidden, action_dim)
    return (w1, b1, w2, b2, w3, b3)


def actor_reference(state, params, max_action):
    """Pure-JAX reference mirroring the kernel math (bf16 weights, f32 accum)."""
    w1, b1, w2, b2, w3, b3 = params
    h1 = jnp.maximum(
        jnp.dot(state.astype(w1.dtype), w1, preferred_element_type=jnp.float32) + b1, 0.0)
    h2 = jnp.maximum(
        jnp.dot(h1.astype(w2.dtype), w2, preferred_element_type=jnp.float32) + b2, 0.0)
    return max_action * jnp.tanh(
        jnp.dot(h2.astype(w3.dtype), w3, preferred_element_type=jnp.float32) + b3)


if __name__ == "__main__":
    key = jax.random.PRNGKey(0)
    k_param, k_state = jax.random.split(key)

    state_dim = 16
    action_dim = 4
    max_action = 2.0

    raw_params = init_actor_params(k_param, state_dim, action_dim)
    padded_params, _ = prepare_actor_params(raw_params)

    # Small aligned batch.
    state = jax.random.normal(k_state, (8, state_dim), jnp.float32)
    out = jax.block_until_ready(
        actor_forward(state, padded_params, max_action, action_dim))
    ref = actor_reference(state, raw_params, max_action)
    assert out.shape == (8, action_dim)
    assert jnp.allclose(out, ref, atol=2e-2, rtol=2e-2), (
        f"max abs err = {jnp.max(jnp.abs(out - ref))}")

    # Ragged batch: exercises the partial last grid block (no explicit padding).
    state2 = jax.random.normal(jax.random.fold_in(k_state, 1),
                               (20, state_dim), jnp.float32)
    out2 = jax.block_until_ready(
        actor_forward(state2, padded_params, max_action, action_dim))
    ref2 = actor_reference(state2, raw_params, max_action)
    assert out2.shape == (20, action_dim)
    assert jnp.allclose(out2, ref2, atol=2e-2, rtol=2e-2), (
        f"max abs err = {jnp.max(jnp.abs(out2 - ref2))}")

    print("KERNEL_OK")
</pallas_src>

<mosaic_0001>
module attributes {stable_mosaic.version = 11 : i64} {
  func.func @_actor_kernel(%arg0: i32, %arg1: memref<8x16xf32, #tpu.memory_space<vmem>>, %arg2: memref<16x256xbf16, #tpu.memory_space<vmem>>, %arg3: memref<1x256xf32, #tpu.memory_space<vmem>>, %arg4: memref<256x256xbf16, #tpu.memory_space<vmem>>, %arg5: memref<1x256xf32, #tpu.memory_space<vmem>>, %arg6: memref<256x128xbf16, #tpu.memory_space<vmem>>, %arg7: memref<1x128xf32, #tpu.memory_space<vmem>>, %arg8: memref<8x128xbf16, #tpu.memory_space<vmem>>) attributes {dimension_semantics = [#tpu.dimension_semantics<parallel>], iteration_bounds = array<i64: 1>, scalar_prefetch = 0 : i64, scratch_operands = 0 : i64, tpu.core_type = #tpu.core_type<tc>, window_params = [{transform_indices = @transform_0, window_bounds = array<i64: 8, 16>}, {pipeline_mode = #tpu.pipeline_mode<synchronous>, transform_indices = @transform_1, window_bounds = array<i64: 16, 256>}, {pipeline_mode = #tpu.pipeline_mode<synchronous>, transform_indices = @transform_2, window_bounds = array<i64: 1, 256>}, {pipeline_mode = #tpu.pipeline_mode<synchronous>, transform_indices = @transform_3, window_bounds = array<i64: 256, 256>}, {pipeline_mode = #tpu.pipeline_mode<synchronous>, transform_indices = @transform_4, window_bounds = array<i64: 1, 256>}, {pipeline_mode = #tpu.pipeline_mode<synchronous>, transform_indices = @transform_5, window_bounds = array<i64: 256, 128>}, {pipeline_mode = #tpu.pipeline_mode<synchronous>, transform_indices = @transform_6, window_bounds = array<i64: 1, 128>}, {transform_indices = @transform_7, window_bounds = array<i64: 8, 128>}]} {
    %c0 = arith.constant 0 : index
    %c0_0 = arith.constant 0 : index
    %0 = vector.load %arg1[%c0, %c0_0] : memref<8x16xf32, #tpu.memory_space<vmem>>, vector<8x16xf32>
    %1 = arith.truncf %0 : vector<8x16xf32> to vector<8x16xbf16>
    %c0_1 = arith.constant 0 : index
    %c0_2 = arith.constant 0 : index
    %2 = vector.load %arg2[%c0_1, %c0_2] : memref<16x256xbf16, #tpu.memory_space<vmem>>, vector<16x256xbf16>
    %cst = arith.constant dense<0.000000e+00> : vector<8x256xf32>
    %3 = tpu.matmul %1, %2, %cst {dimension_numbers = #tpu.dot_dimension_numbers<[1], [0], [0], [1], [0, 0, 1, 1], [], []>} : vector<8x16xbf16>, vector<16x256xbf16>, vector<8x256xf32> -> vector<8x256xf32>
    %c0_3 = arith.constant 0 : index
    %c0_4 = arith.constant 0 : index
    %4 = vector.load %arg3[%c0_3, %c0_4] : memref<1x256xf32, #tpu.memory_space<vmem>>, vector<1x256xf32>
    %5 = vector.broadcast %4 : vector<1x256xf32> to vector<8x256xf32>
    %6 = arith.addf %3, %5 : vector<8x256xf32>
    %cst_5 = arith.constant 0.000000e+00 : f32
    %7 = vector.broadcast %cst_5 : f32 to vector<8x256xf32>
    %8 = arith.maximumf %6, %7 : vector<8x256xf32>
    %9 = arith.truncf %8 : vector<8x256xf32> to vector<8x256xbf16>
    %c0_6 = arith.constant 0 : index
    %c0_7 = arith.constant 0 : index
    %10 = vector.load %arg4[%c0_6, %c0_7] : memref<256x256xbf16, #tpu.memory_space<vmem>>, vector<256x256xbf16>
    %cst_8 = arith.constant dense<0.000000e+00> : vector<8x256xf32>
    %11 = tpu.matmul %9, %10, %cst_8 {dimension_numbers = #tpu.dot_dimension_numbers<[1], [0], [0], [1], [0, 0, 1, 1], [], []>} : vector<8x256xbf16>, vector<256x256xbf16>, vector<8x256xf32> -> vector<8x256xf32>
    %c0_9 = arith.constant 0 : index
    %c0_10 = arith.constant 0 : index
    %12 = vector.load %arg5[%c0_9, %c0_10] : memref<1x256xf32, #tpu.memory_space<vmem>>, vector<1x256xf32>
    %13 = vector.broadcast %12 : vector<1x256xf32> to vector<8x256xf32>
    %14 = arith.addf %11, %13 : vector<8x256xf32>
    %cst_11 = arith.constant 0.000000e+00 : f32
    %15 = vector.broadcast %cst_11 : f32 to vector<8x256xf32>
    %16 = arith.maximumf %14, %15 : vector<8x256xf32>
    %17 = arith.truncf %16 : vector<8x256xf32> to vector<8x256xbf16>
    %c0_12 = arith.constant 0 : index
    %c0_13 = arith.constant 0 : index
    %18 = vector.load %arg6[%c0_12, %c0_13] : memref<256x128xbf16, #tpu.memory_space<vmem>>, vector<256x128xbf16>
    %cst_14 = arith.constant dense<0.000000e+00> : vector<8x128xf32>
    %19 = tpu.matmul %17, %18, %cst_14 {dimension_numbers = #tpu.dot_dimension_numbers<[1], [0], [0], [1], [0, 0, 1, 1], [], []>} : vector<8x256xbf16>, vector<256x128xbf16>, vector<8x128xf32> -> vector<8x128xf32>
    %c0_15 = arith.constant 0 : index
    %c0_16 = arith.constant 0 : index
    %20 = vector.load %arg7[%c0_15, %c0_16] : memref<1x128xf32, #tpu.memory_space<vmem>>, vector<1x128xf32>
    %21 = vector.broadcast %20 : vector<1x128xf32> to vector<8x128xf32>
    %22 = arith.addf %19, %21 : vector<8x128xf32>
    %23 = math.tanh %22 : vector<8x128xf32>
    %cst_17 = arith.constant 2.000000e+00 : f32
    %24 = vector.broadcast %cst_17 : f32 to vector<8x128xf32>
    %25 = arith.mulf %24, %23 : vector<8x128xf32>
    %26 = arith.truncf %25 : vector<8x128xf32> to vector<8x128xbf16>
    %c0_18 = arith.constant 0 : index
    %c0_19 = arith.constant 0 : index
    %27 = vector.load %arg8[%c0_18, %c0_19] : memref<8x128xbf16, #tpu.memory_space<vmem>>, vector<8x128xbf16>
    tpu.vector_store %arg8[%c0_18, %c0_19], %26 {strides = array<i32>} : memref<8x128xbf16, #tpu.memory_space<vmem>>, vector<8x128xbf16>,
    return
  }
  func.func @transform_0(%arg0: i32) -> (i32, i32) {
    %c0_i32 = arith.constant 0 : i32
    %c0_i32_0 = arith.constant 0 : i32
    return %arg0, %c0_i32 : i32, i32
  }
  func.func @transform_1(%arg0: i32) -> (i32, i32) {
    %c0_i32 = arith.constant 0 : i32
    %c0_i32_0 = arith.constant 0 : i32
    %c0_i32_1 = arith.constant 0 : i32
    return %c0_i32, %c0_i32_0 : i32, i32
  }
  func.func @transform_2(%arg0: i32) -> (i32, i32) {
    %c0_i32 = arith.constant 0 : i32
    %c0_i32_0 = arith.constant 0 : i32
    %c0_i32_1 = arith.constant 0 : i32
    return %c0_i32, %c0_i32_0 : i32, i32
  }
  func.func @transform_3(%arg0: i32) -> (i32, i32) {
    %c0_i32 = arith.constant 0 : i32
    %c0_i32_0 = arith.constant 0 : i32
    %c0_i32_1 = arith.constant 0 : i32
    return %c0_i32, %c0_i32_0 : i32, i32
  }
  func.func @transform_4(%arg0: i32) -> (i32, i32) {
    %c0_i32 = arith.constant 0 : i32
    %c0_i32_0 = arith.constant 0 : i32
    %c0_i32_1 = arith.constant 0 : i32
    return %c0_i32, %c0_i32_0 : i32, i32
  }
  func.func @transform_5(%arg0: i32) -> (i32, i32) {
    %c0_i32 = arith.constant 0 : i32
    %c0_i32_0 = arith.constant 0 : i32
    %c0_i32_1 = arith.constant 0 : i32
    return %c0_i32, %c0_i32_0 : i32, i32
  }
  func.func @transform_6(%arg0: i32) -> (i32, i32) {
    %c0_i32 = arith.constant 0 : i32
    %c0_i32_0 = arith.constant 0 : i32
    %c0_i32_1 = arith.constant 0 : i32
    return %c0_i32, %c0_i32_0 : i32, i32
  }
  func.func @transform_7(%arg0: i32) -> (i32, i32) {
    %c0_i32 = arith.constant 0 : i32
    %c0_i32_0 = arith.constant 0 : i32
    return %arg0, %c0_i32 : i32, i32
  }
}

</mosaic_0001>

<bundles_post_ra>
// kernel: tpu_custom_call.1
= control target key start
LH: loop header
LB: loop body
LE: loop exit
PB: predicated region body
PF: predicated region fallthrough
CT: control target
= control target key end

     0   :  { %12 = vsyncpa [#allocation3], 0  ;;  %s997_s0 = inlined_call_operand.hbm [shape: f32[8,16], index: 0, kind: input, shape index: {}]   ;;  %s998_s1 = inlined_call_operand.hbm [shape: bf16[16,256], index: 1, kind: input, shape index: {}]   ;;  %s999_s2 = inlined_call_operand.vmem [shape: f32[1,256], index: 2, kind: input, shape index: {}]   ;;  %s1000_s3 = inlined_call_operand.hbm [shape: bf16[256,256], index: 3, kind: input, shape index: {}]   ;;  %s1001_s4 = inlined_call_operand.vmem [shape: f32[1,256], index: 4, kind: input, shape index: {}]   ;;  %s1002_s5 = inlined_call_operand.hbm [shape: bf16[256,128], index: 5, kind: input, shape index: {}]   ;;  %s1003_s6 = inlined_call_operand.vmem [shape: f32[1,128], index: 6, kind: input, shape index: {}]   ;;  %s1004_s7 = inlined_call_operand.hbm [shape: bf16[8,128], index: 7, kind: output, shape index: {}]  }
   0x1   :  { %13 = vsyncpa [#allocation6], 0 }
   0x2   :  { %14 = vsyncpa [#allocation9], 0 }
   0x3   :  { %15 = vsyncpa [#allocation4], 0  ;;  %s872_s24 = smov [#allocation5]   ;;  %s754_s28 = scalar_lea.hbm %s998_s1, 256 }
   0x4   :  { %s31_s25 = sshll.u32 %s872_s24, 4  ;;  %p755_p0 = scmp.ne.s32.totalorder %s998_s1, %s754_s28  ;;  %s32_s25 = int_to_ptr.vmem [resolvable:$true] %s31_s25 }
   0x5   :  { %p758_p1 = scmp.lt.u32.totalorder %s754_s28, %s998_s1 }
   0x7   :  { %p760_p2 = pnand %p758_p1, %p755_p0 }
   0x9   :  { %763 = shalt.err (!%p760_p2)
}
   0xa   :  { %s764_s10 = scalar_lea.vmem %s32_s25, 256  ;;  %p769_p4 = scmp.lt.s32.totalorder %s32_s25, %s32_s25 }
   0xb   :  { %p765_p3 = scmp.ne.s32.totalorder %s32_s25, %s764_s10  ;;  %p770_p5 = scmp.lt.s32.totalorder %s764_s10, %s764_s10 }
   0xd   :  { %p771_p6 = por %p770_p5, %p769_p4 }
   0xf   :  { %p772_p7 = pnand %p771_p6, %p765_p3 }
  0x11   :  { %775 = shalt.err (!%p772_p7)
}
  0x12   :  { %s873_s11 = smov 128   ;;  %s874_s12 = smov 8  }
  0x13   :  { %37 = dma.hbm_to_vmem [thread:$0]  %s998_s1, 256, %s32_s25, [#allocation6], %s873_s11, %s873_s11, %s874_s12  }
  0x14   :  { %s875_s15 = smov [#allocation2]   ;;  %s876_s17 = smov [#allocation7]  }
  0x15   :  { %s22_s16 = sshll.u32 %s875_s15, 4  ;;  %s45_s18 = sshll.u32 %s876_s17, 4  ;;  %s23_s16 = int_to_ptr.vmem [resolvable:$true] %s22_s16  ;;  %s46_s18 = int_to_ptr.vmem [resolvable:$true] %s45_s18 }
  0x16   :  { %s776_s21 = scalar_lea.hbm %s997_s0, 128 }
  0x17   :  { %p777_p8 = scmp.ne.s32.totalorder %s997_s0, %s776_s21  ;;  %p780_p9 = scmp.lt.u32.totalorder %s776_s21, %s997_s0 }
  0x19   :  { %p782_p10 = pnand %p780_p9, %p777_p8 }
  0x1b   :  { %785 = shalt.err (!%p782_p10)
}
  0x1c   :  { %s786_s1 = scalar_lea.vmem %s23_s16, 128  ;;  %p791_p12 = scmp.lt.s32.totalorder %s23_s16, %s23_s16 }
  0x1d   :  { %p787_p11 = scmp.ne.s32.totalorder %s23_s16, %s786_s1  ;;  %p792_p13 = scmp.lt.s32.totalorder %s786_s1, %s786_s1 }
  0x1f   :  { %p793_p0 = por %p792_p13, %p791_p12 }
  0x21   :  { %p794_p1 = pnand %p793_p0, %p787_p11 }
  0x23   :  { %797 = shalt.err (!%p794_p1)
}
  0x24   :  { %25 = dma.hbm_to_vmem [thread:$0]  %s997_s0, 128, %s23_s16, [#allocation3]  }
  0x25   :  { %s798_s30 = scalar_lea.hbm %s1000_s3, 4096 }
  0x26   :  { %p799_p2 = scmp.ne.s32.totalorder %s1000_s3, %s798_s30  ;;  %p802_p3 = scmp.lt.u32.totalorder %s798_s30, %s1000_s3 }
  0x28   :  { %p804_p4 = pnand %p802_p3, %p799_p2 }
  0x2a   :  { %807 = shalt.err (!%p804_p4)
}
  0x2b   :  { %s808_s14 = scalar_lea.vmem %s46_s18, 4096  ;;  %p813_p6 = scmp.lt.s32.totalorder %s46_s18, %s46_s18 }
  0x2c   :  { %p809_p5 = scmp.ne.s32.totalorder %s46_s18, %s808_s14  ;;  %p814_p7 = scmp.lt.s32.totalorder %s808_s14, %s808_s14 }
  0x2e   :  { %p815_p8 = por %p814_p7, %p813_p6 }
  0x30   :  { %p816_p9 = pnand %p815_p8, %p809_p5 }
  0x32   :  { %819 = shalt.err (!%p816_p9)
}
  0x33   :  { %51 = dma.hbm_to_vmem [thread:$0]  %s1000_s3, 4096, %s46_s18, [#allocation6], %s873_s11, %s873_s11, %s874_s12  }
  0x34   :  { %s877_s16 = smov [#allocation8]   ;;  %s820_s21 = scalar_lea.hbm %s1002_s5, 2048 }
  0x35   :  { %s59_s17 = sshll.u32 %s877_s16, 4  ;;  %p821_p10 = scmp.ne.s32.totalorder %s1002_s5, %s820_s21  ;;  %s60_s17 = int_to_ptr.vmem [resolvable:$true] %s59_s17 }
  0x36   :  { %p824_p11 = scmp.lt.u32.totalorder %s820_s21, %s1002_s5 }
  0x38   :  { %p826_p12 = pnand %p824_p11, %p821_p10 }
  0x3a   :  { %829 = shalt.err (!%p826_p12)
}
  0x3b   :  { %s830_s1 = scalar_lea.vmem %s60_s17, 2048  ;;  %p835_p0 = scmp.lt.s32.totalorder %s60_s17, %s60_s17 }
  0x3c   :  { %p831_p13 = scmp.ne.s32.totalorder %s60_s17, %s830_s1  ;;  %p836_p1 = scmp.lt.s32.totalorder %s830_s1, %s830_s1 }
  0x3e   :  { %p837_p2 = por %p836_p1, %p835_p0 }
  0x40   :  { %p838_p3 = pnand %p837_p2, %p831_p13 }
  0x42   :  { %841 = shalt.err (!%p838_p3)
}
  0x43   :  { %s878_s3 = smov 64   ;;  %s879_s11 = smov 4  }
  0x44   :  { %65 = dma.hbm_to_vmem [thread:$0]  %s1002_s5, 2048, %s60_s17, [#allocation9], %s878_s3, %s878_s3, %s879_s11  }
  0x45   :  { %864 = dma.done.wait [#allocation3], 128  }
  0x46   :  { %865 = vsyncadd [#allocation3], 4294967168 }
  0x47   :  { %866 = dma.done.wait [#allocation6], 4352  }
  0x48   :  { %867 = vsyncadd [#allocation6], 4294962944 }
  0x49   :  { %868 = dma.done.wait [#allocation9], 2048  }
  0x4a   :  { %869 = vsyncadd [#allocation9], 4294965248  ;;  %v880_v0 = vmov 0   ;;  %v685_v1 = vld [vmem:[#allocation5 + $0x4] ss:$8 sps:$4 sm:$0xff]   ;;  %v81_v3 = vld [vmem:[#allocation2] sm:$0xff]  ;;  %v87_v49 = vlaneseq }
  0x4b   :  { %143 = vmatprep.mubr.bf16.mxu0 %v880_v0  ;;  %v687_v2 = vld [vmem:[#allocation5] ss:$8 sps:$4 sm:$0xff]   ;;  %111 = vmatprep.subr.bf16.mxu0 %v685_v1  ;;  %v82_v4 = vpack.c.bf16 %v81_v3, %v81_v3  ;;  %v688_v5 = vld [vmem:[#allocation7 + $0x4] ss:$8 sps:$4 sm:$0xff]   ;;  %v690_v6 = vld [vmem:[#allocation7] ss:$8 sps:$4 sm:$0xff]  }
  0x4c   :  { %112 = vmatpush1.bf16.msra.mxu0 %v687_v2  ;;  %vm107_vm0 = vcmask 130048   ;;  %v691_v7 = vld [vmem:[#allocation7 + $0x14] ss:$8 sps:$4 sm:$0xff]   ;;  %360 = vmatprep.subr.bf16.mxu1 %v688_v5  ;;  %v693_v8 = vld [vmem:[#allocation7 + $0x10] ss:$8 sps:$4 sm:$0xff]   ;;  %v736_v37 = vld [vmem:[#allocation8 + $0x40] sm:$0xff]  }
  0x4d   :  { %361 = vmatpush1.bf16.msra.mxu1 %v690_v6  ;;  %v694_v9 = vld [vmem:[#allocation7 + $0x24] ss:$8 sps:$4 sm:$0xff]   ;;  %v696_v10 = vld [vmem:[#allocation7 + $0x20] ss:$8 sps:$4 sm:$0xff]   ;;  %v697_v11 = vld [vmem:[#allocation7 + $0x34] ss:$8 sps:$4 sm:$0xff]   ;;  %653 = vmatprep.subr.bf16.mxu0 %v736_v37 }
  0x4e   :  { %362 = vmatprep.subr.bf16.mxu1 %v691_v7  ;;  %v699_v12 = vld [vmem:[#allocation7 + $0x30] ss:$8 sps:$4 sm:$0xff]   ;;  %v700_v13 = vld [vmem:[#allocation7 + $0x44] ss:$8 sps:$4 sm:$0xff]   ;;  %v702_v14 = vld [vmem:[#allocation7 + $0x40] ss:$8 sps:$4 sm:$0xff]  }
  0x4f   :  { %603 = vmatmul.mubr.msk.bf16.vlgmr.msra.gmra.mrb[0].mxu0 %vm107_vm0, %v82_v4  ;;  %v703_v15 = vld [vmem:[#allocation7 + $0x54] ss:$8 sps:$4 sm:$0xff]   ;;  %v705_v16 = vld [vmem:[#allocation7 + $0x50] ss:$8 sps:$4 sm:$0xff]   ;;  %v706_v17 = vld [vmem:[#allocation7 + $0x64] ss:$8 sps:$4 sm:$0xff]  }
  0x50   :  { %v708_v18 = vld [vmem:[#allocation7 + $0x60] ss:$8 sps:$4 sm:$0xff]   ;;  %v709_v19 = vld [vmem:[#allocation7 + $0x74] ss:$8 sps:$4 sm:$0xff]   ;;  %v711_v20 = vld [vmem:[#allocation7 + $0x70] ss:$8 sps:$4 sm:$0xff]  }
  0x51   :  { %363 = vmatpush1.bf16.msra.mxu1 %v693_v8  ;;  %v712_v21 = vld [vmem:[#allocation7 + $0x84] ss:$8 sps:$4 sm:$0xff]   ;;  %v714_v22 = vld [vmem:[#allocation7 + $0x80] ss:$8 sps:$4 sm:$0xff]   ;;  %v715_v23 = vld [vmem:[#allocation7 + $0x94] ss:$8 sps:$4 sm:$0xff]  }
  0x52   :  { %364 = vmatprep.subr.bf16.mxu1 %v694_v9  ;;  %v717_v24 = vld [vmem:[#allocation7 + $0x90] ss:$8 sps:$4 sm:$0xff]   ;;  %v718_v25 = vld [vmem:[#allocation7 + $0xa4] ss:$8 sps:$4 sm:$0xff]   ;;  %v720_v26 = vld [vmem:[#allocation7 + $0xa0] ss:$8 sps:$4 sm:$0xff]  }
  0x53   :  { %v721_v27 = vld [vmem:[#allocation7 + $0xb4] ss:$8 sps:$4 sm:$0xff]   ;;  %v723_v28 = vld [vmem:[#allocation7 + $0xb0] ss:$8 sps:$4 sm:$0xff]   ;;  %v724_v29 = vld [vmem:[#allocation7 + $0xc4] ss:$8 sps:$4 sm:$0xff]  }
  0x54   :  { %v726_v30 = vld [vmem:[#allocation7 + $0xc0] ss:$8 sps:$4 sm:$0xff]   ;;  %v727_v31 = vld [vmem:[#allocation7 + $0xd4] ss:$8 sps:$4 sm:$0xff]   ;;  %v729_v32 = vld [vmem:[#allocation7 + $0xd0] ss:$8 sps:$4 sm:$0xff]  }
  0x55   :  { %365 = vmatpush1.bf16.msra.mxu1 %v696_v10  ;;  %v730_v33 = vld [vmem:[#allocation7 + $0xe4] ss:$8 sps:$4 sm:$0xff]   ;;  %v732_v34 = vld [vmem:[#allocation7 + $0xe0] ss:$8 sps:$4 sm:$0xff]   ;;  %v733_v35 = vld [vmem:[#allocation7 + $0xf4] ss:$8 sps:$4 sm:$0xff]  }
  0x56   :  { %366 = vmatprep.subr.bf16.mxu1 %v697_v11  ;;  %v735_v36 = vld [vmem:[#allocation7 + $0xf0] ss:$8 sps:$4 sm:$0xff]   ;;  %v737_v38 = vld [vmem:[#allocation8] sm:$0xff]   ;;  %v738_v39 = vld [vmem:[#allocation8 + $0x48] sm:$0xff]   ;;  %v88_v50 = vshrl.u32 %v87_v49, 7 }
  0x57   :  { %654 = vmatpush3.bf16.msra.mxu0 %v737_v38  ;;  %v739_v40 = vld [vmem:[#allocation8 + $0x8] sm:$0xff]   ;;  %v740_v41 = vld [vmem:[#allocation8 + $0x50] sm:$0xff]   ;;  %v742_v43 = vld [vmem:[#allocation8 + $0x58] sm:$0xff]  }
  0x58   :  { %655 = vmatprep.subr.bf16.mxu0 %v738_v39  ;;  %v741_v42 = vld [vmem:[#allocation8 + $0x10] sm:$0xff]   ;;  %v743_v44 = vld [vmem:[#allocation8 + $0x18] sm:$0xff]   ;;  %v744_v45 = vld [vmem:[#allocation8 + $0x60] sm:$0xff]   ;;  %v89_v51 = vsub.s32 0, %v88_v50  ;;  %v93_v53 = vsub.s32 1, %v88_v50 }
  0x59   :  { %367 = vmatpush1.bf16.msra.mxu1 %v699_v12  ;;  %v745_v46 = vld [vmem:[#allocation8 + $0x20] sm:$0xff]   ;;  %v746_v47 = vld [vmem:[#allocation8 + $0x68] sm:$0xff]   ;;  %v748_v2 = vld [vmem:[#allocation8 + $0x70] sm:$0xff]  }
  0x5a   :  { %368 = vmatprep.subr.bf16.mxu1 %v700_v13  ;;  %v747_v48 = vld [vmem:[#allocation8 + $0x28] sm:$0xff]   ;;  %v749_v3 = vld [vmem:[#allocation8 + $0x30] sm:$0xff]   ;;  %v750_v4 = vld [vmem:[#allocation8 + $0x78] sm:$0xff]  }
  0x5b   :  { %656 = vmatpush3.bf16.msra.mxu0 %v739_v40  ;;  %v85_v52 = vld [vmem:[%s999_s2] sm:$0x3]  ;;  %v751_v5 = vld [vmem:[#allocation8 + $0x38] sm:$0xff]  }
  0x5c   :  { %657 = vmatprep.subr.bf16.mxu0 %v740_v41  ;;  %v90_v54 = vrot.slane %v85_v52, %v89_v51  ;;  %v94_v55 = vrot.slane %v85_v52, %v93_v53  ;;  %v188_v6 = vld [vmem:[%s1001_s4] sm:$0x3]  ;;  %s881_s4 = smov [#allocation10]  }
  0x5d   :  { %369 = vmatpush1.bf16.msra.mxu1 %v702_v14  ;;  %v193_v7 = vrot.slane %v188_v6, %v89_v51  ;;  %v197_v8 = vrot.slane %v188_v6, %v93_v53  ;;  %s590_s30 = sshll.u32 %s881_s4, 4  ;;  %s591_s30 = int_to_ptr.vmem [resolvable:$true] %s590_s30 }
  0x5e   :  { %370 = vmatprep.subr.bf16.mxu1 %v703_v15  ;;  %s842_s8 = scalar_lea.vmem %s591_s30, 64  ;;  %p847_p5 = scmp.lt.s32.totalorder %s591_s30, %s591_s30 }
  0x5f   :  { %658 = vmatpush3.bf16.msra.mxu0 %v741_v42  ;;  %p843_p4 = scmp.ne.s32.totalorder %s591_s30, %s842_s8  ;;  %p848_p6 = scmp.lt.s32.totalorder %s842_s8, %s842_s8 }
  0x60   :  { %659 = vmatprep.subr.bf16.mxu0 %v742_v43 }
  0x61   :  { %371 = vmatpush1.bf16.msra.mxu1 %v705_v16  ;;  %p849_p7 = por %p848_p6, %p847_p5 }
  0x62   :  { %372 = vmatprep.subr.bf16.mxu1 %v706_v17 }
  0x63   :  { %660 = vmatpush3.bf16.msra.mxu0 %v743_v44  ;;  %p850_p8 = pnand %p849_p7, %p843_p4 }
  0x64   :  { %661 = vmatprep.subr.bf16.mxu0 %v744_v45 }
  0x65   :  { %373 = vmatpush1.bf16.msra.mxu1 %v708_v18 }
  0x66   :  { %374 = vmatprep.subr.bf16.mxu1 %v709_v19 }
  0x67   :  { %662 = vmatpush3.bf16.msra.mxu0 %v745_v46 }
  0x68   :  { %663 = vmatprep.subr.bf16.mxu0 %v746_v47 }
  0x69   :  { %375 = vmatpush1.bf16.msra.mxu1 %v711_v20  ;;  %v636_v20 = vld [vmem:[%s1003_s6] ss:$0 sm:$0xff] }
  0x6a   :  { %376 = vmatprep.subr.bf16.mxu1 %v712_v21 }
  0x6b   :  { %664 = vmatpush3.bf16.msra.mxu0 %v747_v48 }
  0x6c   :  { %665 = vmatprep.subr.bf16.mxu0 %v748_v2 }
  0x6d   :  { %377 = vmatpush1.bf16.msra.mxu1 %v714_v22 }
  0x6e   :  { %378 = vmatprep.subr.bf16.mxu1 %v715_v23 }
  0x6f   :  { %666 = vmatpush3.bf16.msra.mxu0 %v749_v3 }
  0x70   :  { %667 = vmatprep.subr.bf16.mxu0 %v750_v4 }
  0x71   :  { %379 = vmatpush1.bf16.msra.mxu1 %v717_v24 }
  0x72   :  { %380 = vmatprep.subr.bf16.mxu1 %v718_v25 }
  0x73   :  { %668 = vmatpush3.bf16.msra.mxu0 %v751_v5 }
  0x75   :  { %381 = vmatpush1.bf16.msra.mxu1 %v720_v26 }
  0x76   :  { %382 = vmatprep.subr.bf16.mxu1 %v721_v27 }
  0x79   :  { %383 = vmatpush1.bf16.msra.mxu1 %v723_v28 }
  0x7a   :  { %384 = vmatprep.subr.bf16.mxu1 %v724_v29 }
  0x7d   :  { %385 = vmatpush1.bf16.msra.mxu1 %v726_v30 }
  0x7e   :  { %386 = vmatprep.subr.bf16.mxu1 %v727_v31 }
  0x81   :  { %387 = vmatpush1.bf16.msra.mxu1 %v729_v32 }
  0x82   :  { %388 = vmatprep.subr.bf16.mxu1 %v730_v33 }
  0x85   :  { %389 = vmatpush1.bf16.msra.mxu1 %v732_v34 }
  0x86   :  { %390 = vmatprep.subr.bf16.mxu1 %v733_v35 }
  0x89   :  { %391 = vmatpush1.bf16.msra.mxu1 %v735_v36 }
 0x122   :  { %v145_v56 = vpop.f32.mrb[0].mxu0 }
 0x123   :  { %v146_v57 = vadd.f32 %v145_v56, %v90_v54  ;;  %v147_v58 = vpop.f32.mrb[1].mxu0 }
 0x124   :  { %v148_v59 = vadd.f32 %v147_v58, %v94_v55  ;;  %v149_v60 = vpop.f32.mrb[2].mxu0 }
 0x125   :  { %v152_v61 = vmax.f32 %v146_v57, 0.0  ;;  %v150_v62 = vpop.f32.mrb[3].mxu0 }
 0x126   :  { %v153_v63 = vmax.f32 %v148_v59, 0.0 }
 0x127   :  { %v154_v1 = vpack.c.bf16 %v152_v61, %v152_v61 }
 0x128   :  { %v155_v0 = vpack.c.bf16 %v153_v63, %v153_v63 }
 0x12a   :  { %392 = vmatprep.mubr.bf16.mxu1 %v155_v0 }
 0x12b   :  { %393 = vmatmul.mubr.bf16.vlgmr.msra.gmra.mrb[0].mxu1 %v154_v1 }
 0x1fe   :  { %v394_v9 = vpop.f32.mrb[0].mxu1 }
 0x1ff   :  { %v395_v10 = vadd.f32 %v394_v9, %v193_v7  ;;  %v396_v11 = vpop.f32.mrb[1].mxu1 }
 0x200   :  { %v397_v12 = vadd.f32 %v396_v11, %v197_v8  ;;  %v398_v13 = vpop.f32.mrb[2].mxu1 }
 0x201   :  { %v401_v14 = vmax.f32 %v395_v10, 0.0  ;;  %v399_v15 = vpop.f32.mrb[3].mxu1 }
 0x202   :  { %v402_v16 = vmax.f32 %v397_v12, 0.0 }
 0x203   :  { %v403_v18 = vpack.c.bf16 %v401_v14, %v401_v14 }
 0x204   :  { %v404_v17 = vpack.c.bf16 %v402_v16, %v402_v16 }
 0x206   :  { %572 = vmatprep.mubr.bf16.mxu0 %v404_v17 }
 0x207   :  { %573 = vmatmul.mubr.bf16.vlgmr.msra.gmra.mrb[4].mxu0 %v403_v18 }
 0x2da   :  { %v669_v19 = vpop.f32.mrb[4].mxu0 }
 0x2db   :  { %v670_v21 = vpop.f32.mrb[5].mxu0 }
 0x2dc   :  { %v671_v22 = vadd.f32 %v670_v21, %v669_v19  ;;  %v672_v23 = vpop.f32.mrb[6].mxu0 }
 0x2dd   :  { %v673_v24 = vpop.f32.mrb[7].mxu0 }
 0x2de   :  { %v575_v25 = vadd.f32 %v671_v22, %v636_v20 }
 0x2e0   :  { %752 = vtanh.f32 %v575_v25 }
 0x2ea   :  { %v753_v26 = vpop.eup %752 }
 0x2eb   :  { %v581_v27 = vmul.f32 2.0, %v753_v26 }
 0x2ed   :  { %v582_v28 = vpack.c.bf16 %v581_v27, %v581_v27 }
 0x2ef   :  { %583 = vst [vmem:[#allocation10] sm:$0xf] %v582_v28 }
 0x2f0   :  { %853 = shalt.err (!%p850_p8)
}
 0x2f1   :  { %s854_s10 = scalar_lea.hbm %s1004_s7, 64 }
 0x2f2   :  { %p855_p9 = scmp.ne.s32.totalorder %s1004_s7, %s854_s10  ;;  %p858_p10 = scmp.lt.u32.totalorder %s854_s10, %s1004_s7 }
 0x2f4   :  { %p860_p11 = pnand %p858_p10, %p855_p9 }
 0x2f6   :  { %863 = shalt.err (!%p860_p11)
}
 0x2f7   :  { %593 = dma.vmem_to_hbm [thread:$0]  %s591_s30, 64, %s1004_s7, [#allocation4]  }
 0x2f8   :  { %870 = dma.done.wait [#allocation4], 64  }
 0x2f9   :  { %871 = vsyncadd [#allocation4], 4294967232 }
 0x2fa   :  { %597 = vsyncpa [#allocation3], 1 }
 0x2fb   :  { %598 = vsyncpa [#allocation6], 1 }
 0x2fc   :  { %599 = vsyncpa [#allocation9], 1 }
 0x2fd   :  { %600 = vsyncpa [#allocation4], 1 }

</bundles_post_ra>
